<compile_context>
chip_gen: v6e
topology: v6e:2x2x1
jax: 0.10.0
libtpu: 0.0.40
codegen_flags: <defaults>
</compile_context>

<pallas_src>
import functools

import jax
import jax.numpy as jnp
from jax.experimental import pallas as pl
from jax.experimental.pallas import tpu as pltpu

_LANE = 128


def _round_up(n, m):
    return ((n + m - 1) // m) * m


def _sublane(dtype):
    # Sublane granularity: 8 rows for 32-bit dtypes, 16 for packed 16-bit dtypes.
    return 8 if jnp.dtype(dtype).itemsize >= 4 else 16


def mlp_kernel(x_ref, w1_ref, b1_ref, w2_ref, b2_ref, o_ref):
    """One batch tile per grid step; weights/biases fully resident in VMEM."""
    # Layer 1 on the MXU: (TB, K) @ (K, H_pad), f32 accumulation, bias + ReLU.
    h = jnp.dot(x_ref[...], w1_ref[...], preferred_element_type=jnp.float32)
    h = jnp.maximum(h + b1_ref[...], 0.0)
    # Layer 2: cast activations to the MXU dtype, keep f32 accumulation.
    out = jnp.dot(h.astype(w2_ref.dtype), w2_ref[...],
                  preferred_element_type=jnp.float32)
    o_ref[...] = (out + b2_ref[...]).astype(o_ref.dtype)


def prepare_params(w1, b1, w2, b2, compute_dtype=jnp.bfloat16):
    """One-time packing of the Linear params (hoisted out of the forward).

    w1: (K, H), b1: (1, H), w2: (H, A), b2: (1, A)  (i.e. torch weight.T).
    Pads H and A up to lane multiples -- exact through ReLU: padded H columns
    carry relu(0 + 0) = 0 into zero rows of w2, padded A columns are sliced
    off -- and casts the matmul operands to `compute_dtype`.  Biases stay f32
    since they are added to the f32 accumulator.
    """
    K, H = w1.shape
    A = w2.shape[1]
    H_pad = _round_up(max(H, _LANE), _LANE)
    A_pad = _round_up(max(A, _LANE), _LANE)
    f32 = jnp.float32

    w1p = jnp.zeros((K, H_pad), compute_dtype).at[:, :H].set(w1.astype(compute_dtype))
    b1p = jnp.zeros((1, H_pad), f32).at[:, :H].set(b1.astype(f32))
    w2p = jnp.zeros((H_pad, A_pad), compute_dtype).at[:H, :A].set(w2.astype(compute_dtype))
    b2p = jnp.zeros((1, A_pad), f32).at[:, :A].set(b2.astype(f32))
    return w1p, b1p, w2p, b2p


@functools.partial(jax.jit, static_argnames=("action_size", "block_b"))
def mlp_forward(x, w1p, b1p, w2p, b2p, *, action_size, block_b=1024):
    """x: (B, obs) f32; pre-packed params from prepare_params -> (B, action_size) f32."""
    B, K = x.shape
    H_pad = w1p.shape[1]
    A_pad = w2p.shape[1]
    compute_dtype = w1p.dtype
    sub = _sublane(compute_dtype)  # >= 8, so also valid for the f32 output tile
    f32 = jnp.float32

    # Batch padded only to the sublane multiple.  No K padding: the (TB, K)
    # block's last dim equals the full array dim (legal even when < 128);
    # Mosaic pads lanes internally, so the x HBM read stays B*K elements.
    B_pad = _round_up(B, sub)
    xc = x.astype(compute_dtype)
    if B_pad != B:
        xc = jnp.zeros((B_pad, K), compute_dtype).at[:B].set(xc)

    # cdiv-style gridding: tile is a sublane multiple, partial last tile is
    # masked by Pallas (garbage rows are row-independent and sliced off), and
    # the tile count is kept even when multi-tile for v7x's 2 TensorCores.
    tb = min(_round_up(block_b, sub), B_pad)
    n_tiles = pl.cdiv(B_pad, tb)
    if n_tiles > 1:
        if n_tiles % 2:
            n_tiles += 1
        tb = _round_up(pl.cdiv(B_pad, n_tiles), sub)
    grid = (pl.cdiv(B_pad, tb),)

    out_padded = pl.pallas_call(
        mlp_kernel,
        out_shape=jax.ShapeDtypeStruct((B_pad, A_pad), f32),
        grid=grid,
        in_specs=[
            pl.BlockSpec((tb, K), lambda i: (i, 0)),         # x: batch-tiled, true K
            pl.BlockSpec((K, H_pad), lambda i: (0, 0)),      # w1: resident
            pl.BlockSpec((1, H_pad), lambda i: (0, 0)),      # b1: resident (f32)
            pl.BlockSpec((H_pad, A_pad), lambda i: (0, 0)),  # w2: resident
            pl.BlockSpec((1, A_pad), lambda i: (0, 0)),      # b2: resident (f32)
        ],
        out_specs=pl.BlockSpec((tb, A_pad), lambda i: (i, 0)),  # lane-dense output
        compiler_params=pltpu.CompilerParams(
            dimension_semantics=("parallel",),  # batch tiles are independent
        ),
        # TODO(synk): if hidden_dim / block_b are scaled beyond toy size, set
        # vmem_limit_bytes here and mark the constant-index weight/bias specs
        # with pipeline_mode=pl.Buffered(1) to avoid double-buffering them.
    )(xc, w1p, b1p, w2p, b2p)

    return out_padded[:B, :action_size]


def init_params(key, obs_size, action_size, hidden_dim):
    """Deterministic init mimicking torch.nn.Linear default (uniform +/- 1/sqrt(fan_in))."""
    k1, k2, k3, k4 = jax.random.split(key, 4)
    bound1 = 1.0 / jnp.sqrt(obs_size)
    bound2 = 1.0 / jnp.sqrt(hidden_dim)
    # Stored as (in, out) == torch weight.T
    w1 = jax.random.uniform(k1, (obs_size, hidden_dim), jnp.float32, -bound1, bound1)
    b1 = jax.random.uniform(k2, (1, hidden_dim), jnp.float32, -bound1, bound1)
    w2 = jax.random.uniform(k3, (hidden_dim, action_size), jnp.float32, -bound2, bound2)
    b2 = jax.random.uniform(k4, (1, action_size), jnp.float32, -bound2, bound2)
    return w1, b1, w2, b2


if __name__ == "__main__":
    # CartPole-v1: obs_size=4, action_size=2; hidden_dim=256 as in the module.
    obs_size, action_size, hidden_dim = 4, 2, 256
    batch = 8

    key = jax.random.PRNGKey(0)
    kx, kp = jax.random.split(key)
    x = jax.random.normal(kx, (batch, obs_size), jnp.float32)
    w1, b1, w2, b2 = init_params(kp, obs_size, action_size, hidden_dim)
    ref = jnp.maximum(x @ w1 + b1, 0.0) @ w2 + b2

    # bf16 MXU operands (f32 accumulation) -- the preferred path on v6e/v7x.
    p_bf16 = prepare_params(w1, b1, w2, b2, compute_dtype=jnp.bfloat16)
    out = jax.block_until_ready(mlp_forward(x, *p_bf16, action_size=action_size))
    assert out.shape == (batch, action_size)
    assert jnp.allclose(out, ref, atol=3e-2, rtol=3e-2)

    # f32 compute path: exact check of the kernel plumbing / padding / tiling.
    p_f32 = prepare_params(w1, b1, w2, b2, compute_dtype=jnp.float32)
    out32 = jax.block_until_ready(mlp_forward(x, *p_f32, action_size=action_size))
    assert jnp.allclose(out32, ref, atol=1e-5, rtol=1e-5)

    # Larger batch exercising multi-tile cdiv gridding and partial-tile masking.
    big_batch = 1037  # non-multiple of 8, > one tile
    xb = jax.random.normal(kx, (big_batch, obs_size), jnp.float32)
    refb = jnp.maximum(xb @ w1 + b1, 0.0) @ w2 + b2
    outb32 = jax.block_until_ready(
        mlp_forward(xb, *p_f32, action_size=action_size, block_b=512))
    assert outb32.shape == (big_batch, action_size)
    assert jnp.allclose(outb32, refb, atol=1e-4, rtol=1e-4)
    outb16 = jax.block_until_ready(
        mlp_forward(xb, *p_bf16, action_size=action_size, block_b=512))
    assert jnp.allclose(outb16, refb, atol=5e-2, rtol=5e-2)

    print("KERNEL_OK")
</pallas_src>

<mosaic_0001>
module attributes {stable_mosaic.version = 11 : i64} {
  func.func @mlp_kernel(%arg0: i32, %arg1: memref<16x4xbf16, #tpu.memory_space<vmem>>, %arg2: memref<4x256xbf16, #tpu.memory_space<vmem>>, %arg3: memref<1x256xf32, #tpu.memory_space<vmem>>, %arg4: memref<256x128xbf16, #tpu.memory_space<vmem>>, %arg5: memref<1x128xf32, #tpu.memory_space<vmem>>, %arg6: memref<16x128xf32, #tpu.memory_space<vmem>>) attributes {dimension_semantics = [#tpu.dimension_semantics<parallel>], iteration_bounds = array<i64: 1>, scalar_prefetch = 0 : i64, scratch_operands = 0 : i64, tpu.core_type = #tpu.core_type<tc>, window_params = [{transform_indices = @transform_0, window_bounds = array<i64: 16, 4>}, {pipeline_mode = #tpu.pipeline_mode<synchronous>, transform_indices = @transform_1, window_bounds = array<i64: 4, 256>}, {pipeline_mode = #tpu.pipeline_mode<synchronous>, transform_indices = @transform_2, window_bounds = array<i64: 1, 256>}, {pipeline_mode = #tpu.pipeline_mode<synchronous>, transform_indices = @transform_3, window_bounds = array<i64: 256, 128>}, {pipeline_mode = #tpu.pipeline_mode<synchronous>, transform_indices = @transform_4, window_bounds = array<i64: 1, 128>}, {transform_indices = @transform_5, window_bounds = array<i64: 16, 128>}]} {
    %c0 = arith.constant 0 : index
    %c0_0 = arith.constant 0 : index
    %0 = vector.load %arg1[%c0, %c0_0] : memref<16x4xbf16, #tpu.memory_space<vmem>>, vector<16x4xbf16>
    %c0_1 = arith.constant 0 : index
    %c0_2 = arith.constant 0 : index
    %1 = vector.load %arg2[%c0_1, %c0_2] : memref<4x256xbf16, #tpu.memory_space<vmem>>, vector<4x256xbf16>
    %cst = arith.constant dense<0.000000e+00> : vector<16x256xf32>
    %2 = tpu.matmul %0, %1, %cst {dimension_numbers = #tpu.dot_dimension_numbers<[1], [0], [0], [1], [0, 0, 1, 1], [], []>} : vector<16x4xbf16>, vector<4x256xbf16>, vector<16x256xf32> -> vector<16x256xf32>
    %c0_3 = arith.constant 0 : index
    %c0_4 = arith.constant 0 : index
    %3 = vector.load %arg3[%c0_3, %c0_4] : memref<1x256xf32, #tpu.memory_space<vmem>>, vector<1x256xf32>
    %4 = vector.broadcast %3 : vector<1x256xf32> to vector<16x256xf32>
    %5 = arith.addf %2, %4 : vector<16x256xf32>
    %cst_5 = arith.constant 0.000000e+00 : f32
    %6 = vector.broadcast %cst_5 : f32 to vector<16x256xf32>
    %7 = arith.maximumf %5, %6 : vector<16x256xf32>
    %8 = arith.truncf %7 : vector<16x256xf32> to vector<16x256xbf16>
    %c0_6 = arith.constant 0 : index
    %c0_7 = arith.constant 0 : index
    %9 = vector.load %arg4[%c0_6, %c0_7] : memref<256x128xbf16, #tpu.memory_space<vmem>>, vector<256x128xbf16>
    %cst_8 = arith.constant dense<0.000000e+00> : vector<16x128xf32>
    %10 = tpu.matmul %8, %9, %cst_8 {dimension_numbers = #tpu.dot_dimension_numbers<[1], [0], [0], [1], [0, 0, 1, 1], [], []>} : vector<16x256xbf16>, vector<256x128xbf16>, vector<16x128xf32> -> vector<16x128xf32>
    %c0_9 = arith.constant 0 : index
    %c0_10 = arith.constant 0 : index
    %11 = vector.load %arg5[%c0_9, %c0_10] : memref<1x128xf32, #tpu.memory_space<vmem>>, vector<1x128xf32>
    %12 = vector.broadcast %11 : vector<1x128xf32> to vector<16x128xf32>
    %13 = arith.addf %10, %12 : vector<16x128xf32>
    %c0_11 = arith.constant 0 : index
    %c0_12 = arith.constant 0 : index
    %14 = vector.load %arg6[%c0_11, %c0_12] : memref<16x128xf32, #tpu.memory_space<vmem>>, vector<16x128xf32>
    tpu.vector_store %arg6[%c0_11, %c0_12], %13 {strides = array<i32>} : memref<16x128xf32, #tpu.memory_space<vmem>>, vector<16x128xf32>,
    return
  }
  func.func @transform_0(%arg0: i32) -> (i32, i32) {
    %c0_i32 = arith.constant 0 : i32
    %c0_i32_0 = arith.constant 0 : i32
    return %arg0, %c0_i32 : i32, i32
  }
  func.func @transform_1(%arg0: i32) -> (i32, i32) {
    %c0_i32 = arith.constant 0 : i32
    %c0_i32_0 = arith.constant 0 : i32
    %c0_i32_1 = arith.constant 0 : i32
    return %c0_i32, %c0_i32_0 : i32, i32
  }
  func.func @transform_2(%arg0: i32) -> (i32, i32) {
    %c0_i32 = arith.constant 0 : i32
    %c0_i32_0 = arith.constant 0 : i32
    %c0_i32_1 = arith.constant 0 : i32
    return %c0_i32, %c0_i32_0 : i32, i32
  }
  func.func @transform_3(%arg0: i32) -> (i32, i32) {
    %c0_i32 = arith.constant 0 : i32
    %c0_i32_0 = arith.constant 0 : i32
    %c0_i32_1 = arith.constant 0 : i32
    return %c0_i32, %c0_i32_0 : i32, i32
  }
  func.func @transform_4(%arg0: i32) -> (i32, i32) {
    %c0_i32 = arith.constant 0 : i32
    %c0_i32_0 = arith.constant 0 : i32
    %c0_i32_1 = arith.constant 0 : i32
    return %c0_i32, %c0_i32_0 : i32, i32
  }
  func.func @transform_5(%arg0: i32) -> (i32, i32) {
    %c0_i32 = arith.constant 0 : i32
    %c0_i32_0 = arith.constant 0 : i32
    return %arg0, %c0_i32 : i32, i32
  }
}

</mosaic_0001>

<bundles_post_ra>
// kernel: mlp_forward.1
= control target key start
LH: loop header
LB: loop body
LE: loop exit
PB: predicated region body
PF: predicated region fallthrough
CT: control target
= control target key end

     0   :  { %10 = vsyncpa [#allocation3], 0  ;;  %s393_s18 = smov [#allocation2]   ;;  %s448_s0 = inlined_call_operand.vmem [shape: bf16[16,4], index: 0, kind: input, shape index: {}]   ;;  %s449_s1 = inlined_call_operand.vmem [shape: bf16[4,256], index: 1, kind: input, shape index: {}]   ;;  %s450_s2 = inlined_call_operand.vmem [shape: f32[1,256], index: 2, kind: input, shape index: {}]   ;;  %s451_s3 = inlined_call_operand.hbm [shape: bf16[256,128], index: 3, kind: input, shape index: {}]   ;;  %s452_s4 = inlined_call_operand.vmem [shape: f32[1,128], index: 4, kind: input, shape index: {}]   ;;  %s453_s5 = inlined_call_operand.vmem [shape: f32[16,128], index: 5, kind: output, shape index: {}]  }
   0x1   :  { %s22_s19 = sshll.u32 %s393_s18, 4  ;;  %s23_s19 = int_to_ptr.vmem [resolvable:$true] %s22_s19 }
   0x2   :  { %s379_s20 = scalar_lea.vmem %s23_s19, 2048  ;;  %p384_p1 = scmp.lt.s32.totalorder %s23_s19, %s23_s19 }
   0x3   :  { %p380_p0 = scmp.ne.s32.totalorder %s23_s19, %s379_s20  ;;  %p385_p2 = scmp.lt.s32.totalorder %s379_s20, %s379_s20 }
   0x5   :  { %p386_p3 = por %p385_p2, %p384_p1 }
   0x7   :  { %p387_p4 = pnand %p386_p3, %p380_p0 }
   0x9   :  { %390 = shalt.err (!%p387_p4)
}
   0xa   :  { %s394_s21 = smov 64   ;;  %s395_s22 = smov 4  }
   0xb   :  { %28 = dma.hbm_to_vmem [thread:$0]  %s451_s3, 2048, %s23_s19, [#allocation3], %s394_s21, %s394_s21, %s395_s22  }
   0xc   :  { %391 = dma.done.wait [#allocation3], 2048  }
   0xd   :  { %392 = vsyncadd [#allocation3], 4294965248  ;;  %v396_v0 = vmov 0   ;;  %vm68_vm0 = vcmask 1041408   ;;  %v354_v4 = vld [vmem:[%s448_s0] sm:$0xff]   ;;  %v355_v5 = vld [vmem:[#allocation2 + $0x78] sm:$0xff]   ;;  %v40_v21 = vlaneseq }
   0xe   :  { %107 = vmatprep.mubr.bf16.mxu0 %v396_v0  ;;  %v308_v1 = vld.sshfl [vmem:[%s449_s1] sm:$0x33 pattern:$0x76325410]  ;;  %v356_v6 = vld [vmem:[#allocation2 + $0x38] sm:$0xff]   ;;  %vm64_vm1 = vcmask 31744   ;;  %328 = vmatprep.subr.bf16.mxu1 %v355_v5 }
   0xf   :  { %v63_v2 = vcombine.high %v308_v1, %v308_v1  ;;  %v70_v3 = vsel %vm68_vm0, %v308_v1, 0  ;;  %v357_v7 = vld [vmem:[#allocation2 + $0x70] sm:$0xff]   ;;  %329 = vmatpush3.bf16.msra.mxu1 %v356_v6  ;;  %v359_v9 = vld [vmem:[#allocation2 + $0x68] sm:$0xff]   ;;  %v361_v11 = vld [vmem:[#allocation2 + $0x60] sm:$0xff]   ;;  %v41_v22 = vshrl.u32 %v40_v21, 7 }
  0x10   :  { %v358_v8 = vld [vmem:[#allocation2 + $0x30] sm:$0xff]   ;;  %330 = vmatprep.subr.bf16.mxu1 %v357_v7  ;;  %v360_v10 = vld [vmem:[#allocation2 + $0x28] sm:$0xff]   ;;  %v362_v12 = vld [vmem:[#allocation2 + $0x20] sm:$0xff]  }
  0x11   :  { %309 = vmatprep.subr.msk.bf16.mxu0 %vm68_vm0, %v63_v2  ;;  %v363_v13 = vld [vmem:[#allocation2 + $0x58] sm:$0xff]   ;;  %v365_v15 = vld [vmem:[#allocation2 + $0x50] sm:$0xff]   ;;  %v367_v17 = vld [vmem:[#allocation2 + $0x48] sm:$0xff]   ;;  %v46_v23 = vsub.s32 1, %v41_v22  ;;  %v42_v24 = vsub.s32 0, %v41_v22 }
  0x12   :  { %90 = vmatpush1.bf16.msra.mxu0 %v70_v3  ;;  %v364_v14 = vld [vmem:[#allocation2 + $0x18] sm:$0xff]   ;;  %v366_v16 = vld [vmem:[#allocation2 + $0x10] sm:$0xff]   ;;  %v368_v18 = vld [vmem:[#allocation2 + $0x8] sm:$0xff]  }
  0x13   :  { %331 = vmatpush3.bf16.msra.mxu1 %v358_v8  ;;  %v369_v19 = vld [vmem:[#allocation2 + $0x40] sm:$0xff]  }
  0x14   :  { %332 = vmatprep.subr.bf16.mxu1 %v359_v9  ;;  %v370_v20 = vld [vmem:[#allocation2] sm:$0xff]  }
  0x15   :  { %310 = vmatmul.mubr.msk.bf16.vlgmr.msra.gmra.mxu0 %vm64_vm1, %v354_v4  ;;  %v38_v25 = vld [vmem:[%s450_s2] sm:$0x3] }
  0x16   :  { %v47_v27 = vrot.slane %v38_v25, %v46_v23  ;;  %v43_v28 = vrot.slane %v38_v25, %v42_v24  ;;  %v311_v43 = vld [vmem:[%s452_s4] ss:$0 sm:$0xff] }
  0x17   :  { %333 = vmatpush3.bf16.msra.mxu1 %v360_v10 }
  0x18   :  { %334 = vmatprep.subr.bf16.mxu1 %v361_v11 }
  0x1b   :  { %335 = vmatpush3.bf16.msra.mxu1 %v362_v12 }
  0x1c   :  { %336 = vmatprep.subr.bf16.mxu1 %v363_v13 }
  0x1f   :  { %337 = vmatpush3.bf16.msra.mxu1 %v364_v14 }
  0x20   :  { %338 = vmatprep.subr.bf16.mxu1 %v365_v15 }
  0x23   :  { %339 = vmatpush3.bf16.msra.mxu1 %v366_v16 }
  0x24   :  { %340 = vmatprep.subr.bf16.mxu1 %v367_v17 }
  0x27   :  { %341 = vmatpush3.bf16.msra.mxu1 %v368_v18 }
  0x28   :  { %342 = vmatprep.subr.bf16.mxu1 %v369_v19 }
  0x2b   :  { %343 = vmatpush3.bf16.msra.mxu1 %v370_v20 }
  0xd5   :  { %v109_v26 = vpop.f32.mrf.mxu0 }
  0xd6   :  { %v110_v33 = vadd.f32 %v109_v26, %v43_v28 }
  0xd7   :  { %v111_v29 = vpop.f32.mrf.mxu0 }
  0xd8   :  { %v112_v31 = vadd.f32 %v111_v29, %v47_v27  ;;  %v118_v39 = vmax.f32 %v110_v33, 0.0 }
  0xd9   :  { %v113_v30 = vpop.f32.mrf.mxu0 }
  0xda   :  { %v114_v32 = vadd.f32 %v113_v30, %v43_v28  ;;  %v119_v37 = vmax.f32 %v112_v31, 0.0 }
  0xdb   :  { %v115_v34 = vpop.f32.mrf.mxu0 }
  0xdc   :  { %v116_v35 = vadd.f32 %v115_v34, %v47_v27  ;;  %v120_v36 = vmax.f32 %v114_v32, 0.0 }
  0xde   :  { %v121_v38 = vmax.f32 %v116_v35, 0.0  ;;  %v122_v41 = vpack.c.bf16 %v120_v36, %v118_v39 }
  0xe0   :  { %v123_v40 = vpack.c.bf16 %v121_v38, %v119_v37 }
  0xe2   :  { %291 = vmatprep.mubr.bf16.mxu1 %v123_v40 }
  0xe3   :  { %292 = vmatmul.mubr.bf16.vlgmr.msra.gmra.mxu1 %v122_v41 }
 0x1a3   :  { %v344_v42 = vpop.f32.mrf.mxu1 }
 0x1a5   :  { %v345_v44 = vpop.f32.mrf.mxu1 }
 0x1a6   :  { %v346_v45 = vadd.f32 %v345_v44, %v344_v42 }
 0x1a7   :  { %v347_v46 = vpop.f32.mrf.mxu1 }
 0x1a8   :  { %v294_v47 = vadd.f32 %v346_v45, %v311_v43 }
 0x1a9   :  { %v348_v48 = vpop.f32.mrf.mxu1 }
 0x1aa   :  { %300 = vst [vmem:[%s453_s5] sm:$0xff] %v294_v47  ;;  %v349_v49 = vadd.f32 %v348_v48, %v347_v46 }
 0x1ac   :  { %v297_v50 = vadd.f32 %v349_v49, %v311_v43 }
 0x1ae   :  { %301 = vst [vmem:[%s453_s5 + $0x8] sm:$0xff] %v297_v50 }
 0x1af   :  { %306 = vsyncpa [#allocation3], 1 }

</bundles_post_ra>
